<compile_context>
chip_gen: v5e
topology: v5e:2x2
jax: 0.10.0
libtpu: 0.0.40
codegen_flags: <defaults>
</compile_context>

<pallas_src>
import jax
import jax.numpy as jnp
from jax.experimental import pallas as pl
from jax.experimental.pallas import tpu as pltpu


# ---------------------------------------------------------------------------
# Pallas kernel: pointwise (1x1) conv as a lane-dense tiled matmul + bias add.
# ---------------------------------------------------------------------------
def _pointwise_conv_kernel(x_ref, w_ref, b_ref, o_ref):
    # x_ref: (K, TM) bf16   w_ref: (OC, K) bf16   b_ref: (OC, 1) f32   o_ref: (OC, TM) f32
    acc = jnp.dot(w_ref[...], x_ref[...], preferred_element_type=jnp.float32)
    o_ref[...] = (acc + b_ref[...]).astype(o_ref.dtype)


def pointwise_conv_lanedense(xu, w2d, b2d, *, tm, out_dtype=jnp.float32):
    """xu: (N, K, S) with S % tm == 0; w2d: (OC, K); b2d: (OC, 1) -> (N, OC, S)."""
    N, K, S = xu.shape
    OC = w2d.shape[0]
    n_tiles = S // tm

    # v7x megacore sharding: both axes "parallel"; lead with whichever extent
    # keeps the 2 TensorCores busy (even / larger first).  No effect on v5e/v6e.
    spatial_major = (N % 2 == 1) and (n_tiles > 1)
    if spatial_major:
        grid = (n_tiles, N)
        xmap = lambda s, n: (n, 0, s)
        wmap = lambda s, n: (0, 0)
        bmap = lambda s, n: (0, 0)
        omap = lambda s, n: (n, 0, s)
    else:
        grid = (N, n_tiles)
        xmap = lambda n, s: (n, 0, s)
        wmap = lambda n, s: (0, 0)
        bmap = lambda n, s: (0, 0)
        omap = lambda n, s: (n, 0, s)

    # VMEM budget: double-buffered activation / output tiles + resident weight
    # and bias, plus slack.  Avoids the fixed 32 MiB cap artificially shrinking
    # tiles on v5e/v6e while staying well inside v7x's 64 MiB.
    out_itemsize = jnp.dtype(out_dtype).itemsize
    tile_bytes = 2 * K * tm * xu.dtype.itemsize + 2 * OC * tm * out_itemsize
    weight_bytes = 2 * (OC * K * w2d.dtype.itemsize + OC * b2d.dtype.itemsize)
    vmem_limit = int(min(100 * 1024 * 1024,
                         max(16 * 1024 * 1024,
                             2 * (tile_bytes + weight_bytes) + (4 << 20))))

    flops = 2 * N * OC * K * S
    bytes_accessed = (xu.size * xu.dtype.itemsize
                      + w2d.size * w2d.dtype.itemsize
                      + b2d.size * b2d.dtype.itemsize
                      + N * OC * S * out_itemsize)

    return pl.pallas_call(
        _pointwise_conv_kernel,
        out_shape=jax.ShapeDtypeStruct((N, OC, S), out_dtype),
        grid_spec=pltpu.PrefetchScalarGridSpec(
            num_scalar_prefetch=0,
            grid=grid,
            in_specs=[
                # activations: spatial tile on the lane axis, full K on sublanes
                pl.BlockSpec((None, K, tm), xmap),
                # full weight + bias, resident across the grid (tiny for 1x1 conv)
                pl.BlockSpec((OC, K), wmap),
                pl.BlockSpec((OC, 1), bmap),
            ],
            out_specs=pl.BlockSpec((None, OC, tm), omap),
        ),
        compiler_params=pltpu.CompilerParams(
            dimension_semantics=("parallel", "parallel"),
            vmem_limit_bytes=vmem_limit,
        ),
        cost_estimate=pl.CostEstimate(
            flops=int(flops), transcendentals=0, bytes_accessed=int(bytes_accessed)),
    )(xu, w2d, b2d)


# ---------------------------------------------------------------------------
# DownBlock forward (glue + kernel call)
# ---------------------------------------------------------------------------
def _round_up(v, m):
    return (v + m - 1) // m * m


def pixel_unshuffle(x, r):
    """PyTorch nn.PixelUnshuffle semantics on NCHW input -> (N, C*r*r, H//r, W//r)."""
    N, C, H, W = x.shape
    Ho, Wo = H // r, W // r
    x = x.reshape(N, C, Ho, r, Wo, r)
    x = jnp.transpose(x, (0, 1, 3, 5, 2, 4))            # (N, C, r, r, Ho, Wo)
    return x.reshape(N, C * r * r, Ho, Wo)               # channel = c*r*r + i*r + j


def down_block_forward(x, weight, bias, scale_factor=2, tm_target=2048,
                       compute_dtype=jnp.bfloat16):
    """x: (N, C, H, W); weight: (OC, C*r*r, 1, 1); bias: (OC,) -> (N, OC, H//r, W//r) f32."""
    r = scale_factor
    N, C, H, W = x.shape
    OC = weight.shape[0]
    Ho, Wo = H // r, W // r
    K = C * r * r
    S = Ho * Wo

    # Cast first so the unavoidable XLA unshuffle transpose reads f32 x once and
    # writes / re-reads the rearranged tensor in bf16 (half the extra traffic).
    xu = pixel_unshuffle(x.astype(compute_dtype), r).reshape(N, K, S)

    w2d = weight.reshape(OC, K).astype(compute_dtype)     # (OC, K) -- no transpose
    b2d = bias.reshape(OC, 1).astype(jnp.float32)          # bias stays f32

    # Spatial (lane) tile: pad S only up to a multiple of 128, then pick the
    # largest multiple of 128 that divides S_pad and is <= tm_target.
    S_pad = _round_up(S, 128)
    q = S_pad // 128
    d_cap = max(1, min(q, tm_target // 128))
    d = max(dd for dd in range(1, d_cap + 1) if q % dd == 0)
    tm = 128 * d
    if S_pad != S:
        xu = jnp.pad(xu, ((0, 0), (0, 0), (0, S_pad - S)))

    out = pointwise_conv_lanedense(xu, w2d, b2d, tm=tm, out_dtype=jnp.float32)
    # Padded columns hold 0*w + bias; slice them off BEFORE reshaping (correctness).
    return out[:, :, :S].reshape(N, OC, Ho, Wo)


# ---------------------------------------------------------------------------
# main
# ---------------------------------------------------------------------------
if __name__ == "__main__":
    # Small shapes consistent with the module: N=2, in_channels=4, H=W=16, r=2.
    N, C, H, W = 2, 4, 16, 16
    r = 2
    OC = 8
    K = C * r * r  # 16

    key = jax.random.PRNGKey(0)
    kx, kw, kb = jax.random.split(key, 3)

    x = jax.random.normal(kx, (N, C, H, W), dtype=jnp.float32)

    # Deterministic Conv2d-style init (kaiming-uniform-ish bounds).
    fan_in = K  # kernel_size = 1
    bound = 1.0 / jnp.sqrt(fan_in)
    weight = jax.random.uniform(kw, (OC, K, 1, 1), jnp.float32, -bound, bound)
    bias = jax.random.uniform(kb, (OC,), jnp.float32, -bound, bound)

    out = jax.block_until_ready(down_block_forward(x, weight, bias, r))
    assert out.shape == (N, OC, H // r, W // r)

    # Reference 1: exact kernel-math check against the bf16-quantized operands.
    xu_ref = pixel_unshuffle(x, r).reshape(N, K, (H // r) * (W // r))
    xu_q = xu_ref.astype(jnp.bfloat16).astype(jnp.float32)
    w_q = weight.reshape(OC, K).astype(jnp.bfloat16).astype(jnp.float32)
    ref_q = (jnp.einsum("nks,ok->nos", xu_q, w_q) + bias.reshape(1, OC, 1)) \
        .reshape(N, OC, H // r, W // r)
    assert jnp.allclose(out, ref_q, atol=1e-5, rtol=1e-5), "kernel math mismatch"

    # Reference 2: full-precision module semantics (tolerance relaxed for the
    # bf16 boundary cast, as advised in the perf review).
    ref = (jnp.einsum("nks,ok->nos", xu_ref, weight.reshape(OC, K))
           + bias.reshape(1, OC, 1)).reshape(N, OC, H // r, W // r)
    assert jnp.allclose(out, ref, atol=2e-2, rtol=2e-2), "mismatch vs f32 reference"

    print("KERNEL_OK")
</pallas_src>

<mosaic_0001>
module attributes {stable_mosaic.version = 11 : i64} {
  func.func @_pointwise_conv_kernel(%arg0: i32, %arg1: i32, %arg2: memref<1x16x128xbf16, #tpu.memory_space<vmem>>, %arg3: memref<8x16xbf16, #tpu.memory_space<vmem>>, %arg4: memref<8x1xf32, #tpu.memory_space<vmem>>, %arg5: memref<1x8x128xf32, #tpu.memory_space<vmem>>) attributes {dimension_semantics = [#tpu.dimension_semantics<parallel>, #tpu.dimension_semantics<parallel>], iteration_bounds = array<i64: 2, 1>, scalar_prefetch = 0 : i64, scratch_operands = 0 : i64, tpu.core_type = #tpu.core_type<tc>, window_params = [{transform_indices = @transform_0, window_bounds = array<i64: 1, 16, 128>}, {pipeline_mode = #tpu.pipeline_mode<synchronous>, transform_indices = @transform_1, window_bounds = array<i64: 8, 16>}, {pipeline_mode = #tpu.pipeline_mode<synchronous>, transform_indices = @transform_2, window_bounds = array<i64: 8, 1>}, {transform_indices = @transform_3, window_bounds = array<i64: 1, 8, 128>}]} {
    %c0 = arith.constant 0 : index
    %c0_0 = arith.constant 0 : index
    %0 = vector.load %arg3[%c0, %c0_0] : memref<8x16xbf16, #tpu.memory_space<vmem>>, vector<8x16xbf16>
    %c0_1 = arith.constant 0 : index
    %c0_2 = arith.constant 0 : index
    %c0_3 = arith.constant 0 : index
    %1 = vector.load %arg2[%c0_1, %c0_2, %c0_3] : memref<1x16x128xbf16, #tpu.memory_space<vmem>>, vector<1x16x128xbf16>
    %2 = vector.shape_cast %1 : vector<1x16x128xbf16> to vector<16x128xbf16>
    %cst = arith.constant dense<0.000000e+00> : vector<8x128xf32>
    %3 = tpu.matmul %0, %2, %cst {dimension_numbers = #tpu.dot_dimension_numbers<[1], [0], [0], [1], [0, 0, 1, 1], [], []>} : vector<8x16xbf16>, vector<16x128xbf16>, vector<8x128xf32> -> vector<8x128xf32>
    %c0_4 = arith.constant 0 : index
    %c0_5 = arith.constant 0 : index
    %4 = vector.load %arg4[%c0_4, %c0_5] : memref<8x1xf32, #tpu.memory_space<vmem>>, vector<8x1xf32>
    %5 = vector.broadcast %4 : vector<8x1xf32> to vector<8x128xf32>
    %6 = arith.addf %3, %5 : vector<8x128xf32>
    %c0_6 = arith.constant 0 : index
    %c0_7 = arith.constant 0 : index
    %c0_8 = arith.constant 0 : index
    %7 = vector.load %arg5[%c0_6, %c0_7, %c0_8] : memref<1x8x128xf32, #tpu.memory_space<vmem>>, vector<1x8x128xf32>
    %8 = vector.shape_cast %7 : vector<1x8x128xf32> to vector<8x128xf32>
    %9 = vector.shape_cast %6 : vector<8x128xf32> to vector<1x8x128xf32>
    tpu.vector_store %arg5[%c0_6, %c0_7, %c0_8], %9 {strides = array<i32>} : memref<1x8x128xf32, #tpu.memory_space<vmem>>, vector<1x8x128xf32>,
    return
  }
  func.func @transform_0(%arg0: i32, %arg1: i32) -> (i32, i32, i32) {
    %c0_i32 = arith.constant 0 : i32
    %c0_i32_0 = arith.constant 0 : i32
    return %arg0, %c0_i32, %arg1 : i32, i32, i32
  }
  func.func @transform_1(%arg0: i32, %arg1: i32) -> (i32, i32) {
    %c0_i32 = arith.constant 0 : i32
    %c0_i32_0 = arith.constant 0 : i32
    %c0_i32_1 = arith.constant 0 : i32
    return %c0_i32, %c0_i32_0 : i32, i32
  }
  func.func @transform_2(%arg0: i32, %arg1: i32) -> (i32, i32) {
    %c0_i32 = arith.constant 0 : i32
    %c0_i32_0 = arith.constant 0 : i32
    %c0_i32_1 = arith.constant 0 : i32
    return %c0_i32, %c0_i32_0 : i32, i32
  }
  func.func @transform_3(%arg0: i32, %arg1: i32) -> (i32, i32, i32) {
    %c0_i32 = arith.constant 0 : i32
    %c0_i32_0 = arith.constant 0 : i32
    return %arg0, %c0_i32, %arg1 : i32, i32, i32
  }
}

</mosaic_0001>

<bundles_post_ra>
// kernel: tpu_custom_call.1
= control target key start
LH: loop header
LB: loop body
LE: loop exit
PB: predicated region body
PF: predicated region fallthrough
CT: control target
= control target key end

     0   :  { %8 = vsyncpa [#allocation3], 0  ;;  %s690_s0 = inlined_call_operand.hbm [shape: bf16[2,16,128], index: 0, kind: input, shape index: {}]   ;;  %s691_s1 = inlined_call_operand.vmem [shape: bf16[8,16], index: 1, kind: input, shape index: {}]   ;;  %s692_s2 = inlined_call_operand.vmem [shape: f32[8,1], index: 2, kind: input, shape index: {}]   ;;  %s693_s3 = inlined_call_operand.hbm [shape: f32[2,8,128], index: 3, kind: output, shape index: {}]  }
   0x1   :  { %10 = vsyncpa [#allocation3 + $0x1], 0 }
   0x2   :  { %11 = vsyncpa [#allocation4], 0 }
   0x3   :  { %13 = vsyncpa [#allocation4 + $0x1], 0  ;;  %s564_s12 = smov 0   ;;  %s566_s13 = smov 0  }
   0x4   :  { %s568_s14 = smov 0   ;;  %s570_s15 = smov 0  }
   0x5   :  { %s572_s16 = smov 0   ;;  %s574_s17 = smov 0  }
   0x6 LB: > { %s340_s18 = sadd.s32 4294967295, %s539_s17   ;;  %s341_s19 = sadd.s32 4294967294, %s539_s17   ;;  %s539_s17 = sphi %s574_s17, %s19_s17   ;;  %s535_s16 = sphi %s572_s16, %s702_s16   ;;  %s531_s15 = sphi %s570_s15, %s701_s15   ;;  %s527_s14 = sphi %s568_s14, %s700_s14   ;;  %s523_s13 = sphi %s566_s13, %s699_s13   ;;  %s519_s12 = sphi %s564_s12, %s698_s12  }
   0x7   : > { %s31_s20 = sadd.s32 1, %s535_s16  ;;  %s40_s21 = sadd.s32 1, %s527_s14 }
   0x8   : > { %p33_p0 = scmp.ge.s32.totalorder %s31_s20, 2  ;;  %p47_p1 = scmp.ne.s32.totalorder %s527_s14, %s523_s13 }
   0x9   : > { %p48_p2 = scmp.eq.s32.totalorder %s539_s17, 0  ;;  %p53_p3 = scmp.ne.s32.totalorder %s523_s13, %s519_s12 }
   0xa   : > { %s704_s20 = smov (%p33_p0, %s31_s20), 0  ;;  %p54_p5 = scmp.eq.s32.totalorder %s340_s18, 0 }
   0xb   : > { %p605_p4 = por %p48_p2, %p47_p1  ;;  %s35_s23 = ssub.s32 %s535_s16, %s704_s20 }
   0xc   : > { %p121_p6 = scmp.eq.s32.totalorder %s340_s18, 1  ;;  %p38_p7 = scmp.eq.s32.totalorder %s35_s23, 0 }
   0xd   : > { %p611_p8 = por %p54_p5, %p53_p3  ;;  %p127_p10 = scmp.eq.s32.totalorder %s341_s19, 1 }
   0xe   : > { %p615_p9 = por %p121_p6, %p47_p1  ;;  %p343_p12 = scmp.ge.s32.totalorder %s539_s17, 2 }
   0xf   : > { %s620_s26 = scalar_select %p38_p7, %s527_s14, %s40_s21  }
  0x10   : > { %p622_p11 = por %p127_p10, %p53_p3  ;;  %p373_p13 = scmp.lt.s32.totalorder %s539_s17, 2 }
  0x11   : > { %s153_s28 = sand.u32 1, %s527_s14   ;;  %s359_s30 = sshll.u32 %s535_s16, 3 }
  0x12   : > { %s344_s29 = sshll.u32 %s153_s28, 3  ;;  %s163_s6 = scalar_lea.hbm %s690_s0, %s359_s30 }
  0x13   : > { %s157_s7 = scalar_lea.vmem [#allocation2], %s344_s29  ;;  %s164_s9 = sshll.u32 %s163_s6, 4  ;;  %s165_s9 = int_to_ptr.hbm [resolvable:$true] %s164_s9 }
  0x14   : > { %s166_s8 = sshll.u32 %s157_s7, 4  ;;  %p366_p0 = pnand %p373_p13, %p605_p4  ;;  %s167_s8 = int_to_ptr.vmem [resolvable:$true] %s166_s8 }
  0x15   : > { %p347_p1 = scmp.ge.s32.totalorder %s539_s17, 1  ;;  %s154_s10 = scalar_lea.sflag [#allocation3], %s153_s28 }
  0x16   : > { %s541_s11 = smov 64   ;;  %s542_s18 = smov 4  }
  0x17   : > { %368 = dma.hbm_to_vmem [thread:$0]  (!%p366_p0), %s165_s9, 128, %s167_s8, %s154_s10, %s541_s11, %s541_s11, %s542_s18  }
  0x18   : > { %p174_p2 = scmp.lt.s32.totalorder %s539_s17, 3 }
  0x1a   : > { %p175_p3 = pnand %p347_p1, %p174_p2 }
  0x1b   : > { %s638_s19 = sand.u32 (!%p175_p3), 1, %s523_s13  }
  0x1c   : > { %178 = sbr.rel (%p175_p3) target bundleno = 172 (0xac), region = 32  ;;  %s348_s21 = sshll.u32 (!%p175_p3), %s638_s19, 3 }
  0x1d   : > { %s181_s23 = scalar_lea.sflag (!%p175_p3), [#allocation3], %s638_s19  ;;  %s184_s29 = scalar_lea.vmem (!%p175_p3), [#allocation2], %s348_s21 }
  0x21   : > { %510 = dma.done.wait (%p611_p8), %s181_s23, 128  }
  0x22   : > { %512 = vsyncadd (%p611_p8), %s181_s23, 4294967168  ;;  %v543_v0 = vmov 0   ;;  %v360_v1 = vld [vmem:[%s184_s29] sm:$0xff]  ;;  %vm224_vm0 = vcmask 130048   ;;  %s356_s5 = sshll.u32 %s531_s15, 3  ;;  %s207_s8 = scalar_lea.vmem [#allocation5], %s348_s21 }
  0x23   : > { %426 = vset.pattern.permute.xlu0 %v543_v0  ;;  %v212_v2 = vld [vmem:[%s692_s2] sm:$0xff]  ;;  %235 = vmatpush.bf16.msra.mxu0 %v360_v1  ;;  %s254_s7 = scalar_lea.hbm %s693_s3, %s356_s5  ;;  %s256_s9 = sshll.u32 %s207_s8, 4  ;;  %s257_s9 = int_to_ptr.vmem [resolvable:$true] %s256_s9 }
  0x24   : > { %215 = vperm.xlu0 %426, %v212_v2   ;;  %v209_v3 = vld [vmem:[%s691_s1] sm:$0xf]  ;;  %s258_s10 = sshll.u32 %s254_s7, 4  ;;  %s243_s11 = scalar_lea.sflag [#allocation4], %s638_s19  ;;  %s259_s10 = int_to_ptr.hbm [resolvable:$true] %s258_s10 }
  0x25   : > { %s471_s18 = sshra.s32 %s259_s10, 4  ;;  %s477_s22 = scalar_lea.hbm %s693_s3, 16  ;;  %s472_s18 = int_to_ptr.hbm [resolvable:$true] %s471_s18 }
  0x26   : > { %354 = vmatmul.msk.bf16.vlgmr.msra.gmra.mxu0 %vm224_vm0, %v209_v3  ;;  %s473_s23 = scalar_lea.hbm %s472_s18, 8  ;;  %p478_p7 = scmp.lt.s32.totalorder %s472_s18, %s693_s3 }
  0x27   : > { %p474_p4 = scmp.ne.s32.totalorder %s472_s18, %s473_s23  ;;  %p479_p8 = scmp.lt.s32.totalorder %s477_s22, %s473_s23 }
  0x29   : > { %p475_p5 = pnand %p474_p4, %p615_p9  ;;  %p480_p10 = por %p479_p8, %p478_p7 }
  0x2b   : > { %p476_p6 = pneg %p475_p5 }
  0x2d   : > { %p481_p13 = pnand %p480_p10, %p476_p6 }
  0x96   : > { %v216_v4 = vpop.permute.xlu0 %215 }
  0xa3   : > { %v237_v5 = vpop.f32.mrf.mxu0 }
  0xa4   : > { %v238_v6 = vadd.f32 %v237_v5, %v216_v4 }
  0xa6   : > { %241 = vst [vmem:[%s207_s8] sm:$0xff] %v238_v6 }
  0xa7   : > { %484 = shalt.err (!%p481_p13)
}
  0xa8   : > { %363 = dma.vmem_to_hbm [thread:$0]  (%p615_p9), %s257_s9, 128, %s259_s10, %s243_s11  }
  0xab   : > { %v239_v7 = vpop.f32.mrf.mxu0 }
  0xac PF: > { %s270_s19 = sand.u32 1, %s519_s12   ;;  %p370_p0 = pnand %p343_p12, %p622_p11 }
  0xad   : > { %s271_s30 = scalar_lea.sflag [#allocation4], %s270_s19 }
  0xae   : > { %p371_p1 = pneg %p370_p0 }
  0xb0   : > { %514 = dma.done.wait (%p371_p1), %s271_s30, 128  }
  0xb1   : > { %516 = vsyncadd (%p371_p1), %s271_s30, 4294967168  ;;  %s19_s17 = sadd.s32 1, %s539_s17   ;;  %s698_s12 = smov %s523_s13 }
  0xb2   : > { %p16_p2 = scmp.ge.s32.totalorder %s19_s17, 4   ;;  %s699_s13 = smov %s527_s14 }
  0xb3   : > { %s700_s14 = smov %s620_s26  ;;  %s701_s15 = smov %s535_s16 }
  0xb4   : > { %s702_s16 = smov %s704_s20  ;;  %18 = sbr.rel (!%p16_p2) target bundleno = 6 (0x6), region = 77 }
  0xb9   :  { %277 = vsyncpa [#allocation3], 1 }
  0xba   :  { %279 = vsyncpa [#allocation3 + $0x1], 1 }
  0xbb   :  { %280 = vsyncpa [#allocation4], 1 }
  0xbc   :  { %282 = vsyncpa [#allocation4 + $0x1], 1 }

</bundles_post_ra>
